<compile_context>
chip_gen: v7x
topology: tpu7x:2x2x1
jax: 0.10.0
libtpu: 0.0.40
codegen_flags: <defaults>
</compile_context>

<pallas_src>
import functools

import numpy as np
import jax
import jax.numpy as jnp
from jax import lax
from jax.experimental import pallas as pl
from jax.experimental.pallas import tpu as pltpu

EPS = 1e-3  # BatchNorm eps used by Ultralytics Conv


# ------------------------------ Pallas kernel --------------------------------

def _bottleneck_kernel(mask_ref, x_ref, w1_ref, b1_ref, w2_ref, b2_ref, o_ref,
                       *, shifts, add):
    """Whole Bottleneck for one batch image, everything resident on-chip.

    mask_ref: (9, HW)      0/1 zero-padding masks, one row per 3x3 tap
    x_ref   : (1, C1, HW)  input image, channel-first, spatial flattened
    w1_ref  : (C_, 9*C1)   cv1 weights (BN scale folded in), im2col layout
    b1_ref  : (C_, 1)      cv1 folded BN shift
    w2_ref  : (C2, 9*C_)   cv2 weights (BN scale folded in), im2col layout
    b2_ref  : (C2, 1)      cv2 folded BN shift
    o_ref   : (1, C2, HW)
    shifts  : static tuple of 9 lane-roll amounts (one per tap)
    add     : static bool — residual add (shortcut and c1 == c2)
    """
    hw = x_ref.shape[2]

    def lane_roll(v, s):
        # jnp.roll(v, s, axis=-1) via two lane slices + concat (XLU-side work).
        if s == 0:
            return v
        return jnp.concatenate([v[:, hw - s:], v[:, :hw - s]], axis=1)

    def im2col(z):
        # (C, HW) -> (9*C, HW): nine spatially shifted, boundary-masked taps of
        # the 3x3/pad=1 receptive field, built from the resident tile.
        taps = [lane_roll(z, shifts[t]) * mask_ref[t:t + 1, :] for t in range(9)]
        return jnp.concatenate(taps, axis=0)

    def silu(y):
        return y * (1.0 / (1.0 + jnp.exp(-y)))

    x = x_ref[0]                                                     # (C1, HW)

    # cv1: 3x3 conv (+ folded BN) + SiLU — one MXU matmul.
    h = silu(jnp.dot(w1_ref[...], im2col(x),
                     preferred_element_type=jnp.float32) + b1_ref[...])

    # cv2: 3x3 conv (+ folded BN) + SiLU — one MXU matmul; taps rebuilt from the
    # VMEM-resident intermediate (never touches HBM).
    y = silu(jnp.dot(w2_ref[...], im2col(h),
                     preferred_element_type=jnp.float32) + b2_ref[...])

    if add:                      # static: shortcut and c1 == c2
        y = y + x

    o_ref[0] = y.astype(o_ref.dtype)


# --------------------------------- wrapper ------------------------------------

def _fold_bn_into_weights(w, gamma, beta, mean, var):
    """Conv2d(bias=False)+BN -> (im2col weight matrix with scale folded, bias).

    w: (Cout, Cin, 3, 3) OIHW.  Returns ((Cout, 9*Cin), (Cout, 1)); column order
    of the weight matrix is tap-major then input-channel, matching im2col().
    """
    scale = gamma / jnp.sqrt(var + EPS)          # (Cout,)
    shift = beta - mean * scale                  # (Cout,)
    cout, cin = w.shape[0], w.shape[1]
    wmat = jnp.transpose(w, (0, 2, 3, 1)).reshape(cout, 9 * cin) * scale[:, None]
    return wmat, shift[:, None]


def _tap_masks_and_shifts(H, W):
    """Static zero-padding masks (9, H*W) and lane-roll amounts for 3x3/pad=1."""
    hw = H * W
    rr = np.arange(H)[:, None]
    cc = np.arange(W)[None, :]
    masks, shifts = [], []
    for ki in range(3):
        for kj in range(3):
            di, dj = ki - 1, kj - 1
            valid = ((rr + di >= 0) & (rr + di < H) &
                     (cc + dj >= 0) & (cc + dj < W))
            masks.append(valid.reshape(hw).astype(np.float32))
            shifts.append((-(di * W + dj)) % hw)     # rolled[p] == z[p + off]
    return np.stack(masks, axis=0), tuple(shifts)


@functools.partial(jax.jit, static_argnames=("shortcut",))
def bottleneck_forward_pallas(params, x_nchw, shortcut=True):
    B, C1, H, W = x_nchw.shape
    HW = H * W
    C_ = params["cv1_w"].shape[0]
    C2 = params["cv2_w"].shape[0]
    add = bool(shortcut) and (C1 == C2)

    # One-time (wrapper-side) weight prep: BN folded into weights + bias.
    w1m, b1 = _fold_bn_into_weights(params["cv1_w"], params["cv1_gamma"],
                                    params["cv1_beta"], params["cv1_mean"],
                                    params["cv1_var"])
    w2m, b2 = _fold_bn_into_weights(params["cv2_w"], params["cv2_gamma"],
                                    params["cv2_beta"], params["cv2_mean"],
                                    params["cv2_var"])

    masks_np, shifts = _tap_masks_and_shifts(H, W)
    masks = jnp.asarray(masks_np)

    x_flat = x_nchw.reshape(B, C1, HW)           # free reshape, stays NC(HW)

    kernel = functools.partial(_bottleneck_kernel, shifts=shifts, add=add)
    out = pl.pallas_call(
        kernel,
        out_shape=jax.ShapeDtypeStruct((B, C2, HW), x_nchw.dtype),
        grid=(B,),
        in_specs=[
            pl.BlockSpec((9, HW), lambda b: (0, 0)),         # tap masks
            pl.BlockSpec((1, C1, HW), lambda b: (b, 0, 0)),  # x (one image)
            pl.BlockSpec((C_, 9 * C1), lambda b: (0, 0)),    # cv1 weights
            pl.BlockSpec((C_, 1), lambda b: (0, 0)),         # cv1 bias
            pl.BlockSpec((C2, 9 * C_), lambda b: (0, 0)),    # cv2 weights
            pl.BlockSpec((C2, 1), lambda b: (0, 0)),         # cv2 bias
        ],
        out_specs=pl.BlockSpec((1, C2, HW), lambda b: (b, 0, 0)),
        compiler_params=pltpu.CompilerParams(
            dimension_semantics=("parallel",),       # >=2 steps -> both v7x TCs
            vmem_limit_bytes=32 * 1024 * 1024,       # headroom on v5e's 16 MiB default
        ),
    )(masks, x_flat, w1m, b1, w2m, b2)

    return out.reshape(B, C2, H, W)                  # already NCHW ordered


# ------------------------- parameters & JAX reference -------------------------

def init_bottleneck_params(key, c1, c2, e=0.5):
    c_ = int(c2 * e)
    ks = jax.random.split(key, 10)

    def r(k, shape, s=0.2):
        return s * jax.random.normal(k, shape, jnp.float32)

    return {
        "cv1_w": r(ks[0], (c_, c1, 3, 3)),
        "cv1_gamma": 1.0 + r(ks[1], (c_,), 0.05),
        "cv1_beta": r(ks[2], (c_,), 0.05),
        "cv1_mean": r(ks[3], (c_,), 0.1),
        "cv1_var": 1.0 + jnp.abs(r(ks[4], (c_,), 0.1)),
        "cv2_w": r(ks[5], (c2, c_, 3, 3)),
        "cv2_gamma": 1.0 + r(ks[6], (c2,), 0.05),
        "cv2_beta": r(ks[7], (c2,), 0.05),
        "cv2_mean": r(ks[8], (c2,), 0.1),
        "cv2_var": 1.0 + jnp.abs(r(ks[9], (c2,), 0.1)),
    }


def bottleneck_forward_reference(params, x, shortcut=True):
    dn = ("NCHW", "OIHW", "NCHW")

    def conv_bn_silu(z, w, gamma, beta, mean, var):
        z = lax.conv_general_dilated(z, w, (1, 1), "SAME", dimension_numbers=dn)
        z = (z - mean[None, :, None, None]) / jnp.sqrt(
            var[None, :, None, None] + EPS)
        z = gamma[None, :, None, None] * z + beta[None, :, None, None]
        return z * jax.nn.sigmoid(z)

    y = conv_bn_silu(x, params["cv1_w"], params["cv1_gamma"], params["cv1_beta"],
                     params["cv1_mean"], params["cv1_var"])
    y = conv_bn_silu(y, params["cv2_w"], params["cv2_gamma"], params["cv2_beta"],
                     params["cv2_mean"], params["cv2_var"])
    add = shortcut and (x.shape[1] == y.shape[1])
    return x + y if add else y


# ----------------------------------- main --------------------------------------

if __name__ == "__main__":
    # Bottleneck(c1=8, c2=8, shortcut=True, g=1, k=(3,3), e=0.5)  ->  c_ = 4
    B, C1, H, W = 2, 8, 16, 16
    C2 = 8

    key = jax.random.PRNGKey(0)
    kx, kp = jax.random.split(key)
    x = jax.random.normal(kx, (B, C1, H, W), jnp.float32)
    params = init_bottleneck_params(kp, C1, C2, e=0.5)

    out = jax.block_until_ready(bottleneck_forward_pallas(params, x, shortcut=True))
    ref = jax.block_until_ready(bottleneck_forward_reference(params, x, shortcut=True))

    assert out.shape == (B, C2, H, W), out.shape
    assert jnp.allclose(out, ref, rtol=1e-4, atol=1e-4), \
        float(jnp.max(jnp.abs(out - ref)))
    print("KERNEL_OK")
</pallas_src>

<mosaic_0001>
module attributes {stable_mosaic.version = 11 : i64} {
  func.func @_bottleneck_kernel(%arg0: i32, %arg1: memref<9x256xf32, #tpu.memory_space<vmem>>, %arg2: memref<1x8x256xf32, #tpu.memory_space<vmem>>, %arg3: memref<4x72xf32, #tpu.memory_space<vmem>>, %arg4: memref<4x1xf32, #tpu.memory_space<vmem>>, %arg5: memref<8x36xf32, #tpu.memory_space<vmem>>, %arg6: memref<8x1xf32, #tpu.memory_space<vmem>>, %arg7: memref<1x8x256xf32, #tpu.memory_space<vmem>>) attributes {dimension_semantics = [#tpu.dimension_semantics<parallel>], iteration_bounds = array<i64: 2>, scalar_prefetch = 0 : i64, scratch_operands = 0 : i64, tpu.core_type = #tpu.core_type<tc>, window_params = [{pipeline_mode = #tpu.pipeline_mode<synchronous>, transform_indices = @transform_0, window_bounds = array<i64: 9, 256>}, {transform_indices = @transform_1, window_bounds = array<i64: 1, 8, 256>}, {pipeline_mode = #tpu.pipeline_mode<synchronous>, transform_indices = @transform_2, window_bounds = array<i64: 4, 72>}, {pipeline_mode = #tpu.pipeline_mode<synchronous>, transform_indices = @transform_3, window_bounds = array<i64: 4, 1>}, {pipeline_mode = #tpu.pipeline_mode<synchronous>, transform_indices = @transform_4, window_bounds = array<i64: 8, 36>}, {pipeline_mode = #tpu.pipeline_mode<synchronous>, transform_indices = @transform_5, window_bounds = array<i64: 8, 1>}, {transform_indices = @transform_6, window_bounds = array<i64: 1, 8, 256>}]} {
    %c0 = arith.constant 0 : index
    %c0_0 = arith.constant 0 : index
    %c0_1 = arith.constant 0 : index
    %0 = vector.load %arg2[%c0, %c0_0, %c0_1] : memref<1x8x256xf32, #tpu.memory_space<vmem>>, vector<1x8x256xf32>
    %1 = vector.shape_cast %0 : vector<1x8x256xf32> to vector<8x256xf32>
    %c0_2 = arith.constant 0 : index
    %c0_3 = arith.constant 0 : index
    %2 = vector.load %arg3[%c0_2, %c0_3] : memref<4x72xf32, #tpu.memory_space<vmem>>, vector<4x72xf32>
    %3 = vector.extract_strided_slice %1 {offsets = [0, 239], sizes = [8, 17], strides = [1, 1]} : vector<8x256xf32> to vector<8x17xf32>
    %4 = vector.extract_strided_slice %1 {offsets = [0, 0], sizes = [8, 239], strides = [1, 1]} : vector<8x256xf32> to vector<8x239xf32>
    %5 = tpu.concatenate %3, %4 in 1 : vector<8x17xf32>, vector<8x239xf32> -> vector<8x256xf32>
    %c0_4 = arith.constant 0 : index
    %c0_5 = arith.constant 0 : index
    %6 = vector.load %arg1[%c0_4, %c0_5] : memref<9x256xf32, #tpu.memory_space<vmem>>, vector<1x256xf32>
    %7 = vector.broadcast %6 : vector<1x256xf32> to vector<8x256xf32>
    %8 = arith.mulf %5, %7 : vector<8x256xf32>
    %9 = vector.extract_strided_slice %1 {offsets = [0, 240], sizes = [8, 16], strides = [1, 1]} : vector<8x256xf32> to vector<8x16xf32>
    %10 = vector.extract_strided_slice %1 {offsets = [0, 0], sizes = [8, 240], strides = [1, 1]} : vector<8x256xf32> to vector<8x240xf32>
    %11 = tpu.concatenate %9, %10 in 1 : vector<8x16xf32>, vector<8x240xf32> -> vector<8x256xf32>
    %c1 = arith.constant 1 : index
    %c0_6 = arith.constant 0 : index
    %12 = vector.load %arg1[%c1, %c0_6] : memref<9x256xf32, #tpu.memory_space<vmem>>, vector<1x256xf32>
    %13 = vector.broadcast %12 : vector<1x256xf32> to vector<8x256xf32>
    %14 = arith.mulf %11, %13 : vector<8x256xf32>
    %15 = vector.extract_strided_slice %1 {offsets = [0, 241], sizes = [8, 15], strides = [1, 1]} : vector<8x256xf32> to vector<8x15xf32>
    %16 = vector.extract_strided_slice %1 {offsets = [0, 0], sizes = [8, 241], strides = [1, 1]} : vector<8x256xf32> to vector<8x241xf32>
    %17 = tpu.concatenate %15, %16 in 1 : vector<8x15xf32>, vector<8x241xf32> -> vector<8x256xf32>
    %c2 = arith.constant 2 : index
    %c0_7 = arith.constant 0 : index
    %18 = vector.load %arg1[%c2, %c0_7] : memref<9x256xf32, #tpu.memory_space<vmem>>, vector<1x256xf32>
    %19 = vector.broadcast %18 : vector<1x256xf32> to vector<8x256xf32>
    %20 = arith.mulf %17, %19 : vector<8x256xf32>
    %21 = vector.extract_strided_slice %1 {offsets = [0, 255], sizes = [8, 1], strides = [1, 1]} : vector<8x256xf32> to vector<8x1xf32>
    %22 = vector.extract_strided_slice %1 {offsets = [0, 0], sizes = [8, 255], strides = [1, 1]} : vector<8x256xf32> to vector<8x255xf32>
    %23 = tpu.concatenate %21, %22 in 1 : vector<8x1xf32>, vector<8x255xf32> -> vector<8x256xf32>
    %c3 = arith.constant 3 : index
    %c0_8 = arith.constant 0 : index
    %24 = vector.load %arg1[%c3, %c0_8] : memref<9x256xf32, #tpu.memory_space<vmem>>, vector<1x256xf32>
    %25 = vector.broadcast %24 : vector<1x256xf32> to vector<8x256xf32>
    %26 = arith.mulf %23, %25 : vector<8x256xf32>
    %c4 = arith.constant 4 : index
    %c0_9 = arith.constant 0 : index
    %27 = vector.load %arg1[%c4, %c0_9] : memref<9x256xf32, #tpu.memory_space<vmem>>, vector<1x256xf32>
    %28 = vector.broadcast %27 : vector<1x256xf32> to vector<8x256xf32>
    %29 = arith.mulf %1, %28 : vector<8x256xf32>
    %30 = vector.extract_strided_slice %1 {offsets = [0, 1], sizes = [8, 255], strides = [1, 1]} : vector<8x256xf32> to vector<8x255xf32>
    %31 = vector.extract_strided_slice %1 {offsets = [0, 0], sizes = [8, 1], strides = [1, 1]} : vector<8x256xf32> to vector<8x1xf32>
    %32 = tpu.concatenate %30, %31 in 1 : vector<8x255xf32>, vector<8x1xf32> -> vector<8x256xf32>
    %c5 = arith.constant 5 : index
    %c0_10 = arith.constant 0 : index
    %33 = vector.load %arg1[%c5, %c0_10] : memref<9x256xf32, #tpu.memory_space<vmem>>, vector<1x256xf32>
    %34 = vector.broadcast %33 : vector<1x256xf32> to vector<8x256xf32>
    %35 = arith.mulf %32, %34 : vector<8x256xf32>
    %36 = vector.extract_strided_slice %1 {offsets = [0, 15], sizes = [8, 241], strides = [1, 1]} : vector<8x256xf32> to vector<8x241xf32>
    %37 = vector.extract_strided_slice %1 {offsets = [0, 0], sizes = [8, 15], strides = [1, 1]} : vector<8x256xf32> to vector<8x15xf32>
    %38 = tpu.concatenate %36, %37 in 1 : vector<8x241xf32>, vector<8x15xf32> -> vector<8x256xf32>
    %c6 = arith.constant 6 : index
    %c0_11 = arith.constant 0 : index
    %39 = vector.load %arg1[%c6, %c0_11] : memref<9x256xf32, #tpu.memory_space<vmem>>, vector<1x256xf32>
    %40 = vector.broadcast %39 : vector<1x256xf32> to vector<8x256xf32>
    %41 = arith.mulf %38, %40 : vector<8x256xf32>
    %42 = vector.extract_strided_slice %1 {offsets = [0, 16], sizes = [8, 240], strides = [1, 1]} : vector<8x256xf32> to vector<8x240xf32>
    %43 = vector.extract_strided_slice %1 {offsets = [0, 0], sizes = [8, 16], strides = [1, 1]} : vector<8x256xf32> to vector<8x16xf32>
    %44 = tpu.concatenate %42, %43 in 1 : vector<8x240xf32>, vector<8x16xf32> -> vector<8x256xf32>
    %c7 = arith.constant 7 : index
    %c0_12 = arith.constant 0 : index
    %45 = vector.load %arg1[%c7, %c0_12] : memref<9x256xf32, #tpu.memory_space<vmem>>, vector<1x256xf32>
    %46 = vector.broadcast %45 : vector<1x256xf32> to vector<8x256xf32>
    %47 = arith.mulf %44, %46 : vector<8x256xf32>
    %48 = vector.extract_strided_slice %1 {offsets = [0, 17], sizes = [8, 239], strides = [1, 1]} : vector<8x256xf32> to vector<8x239xf32>
    %49 = vector.extract_strided_slice %1 {offsets = [0, 0], sizes = [8, 17], strides = [1, 1]} : vector<8x256xf32> to vector<8x17xf32>
    %50 = tpu.concatenate %48, %49 in 1 : vector<8x239xf32>, vector<8x17xf32> -> vector<8x256xf32>
    %c8 = arith.constant 8 : index
    %c0_13 = arith.constant 0 : index
    %51 = vector.load %arg1[%c8, %c0_13] : memref<9x256xf32, #tpu.memory_space<vmem>>, vector<1x256xf32>
    %52 = vector.broadcast %51 : vector<1x256xf32> to vector<8x256xf32>
    %53 = arith.mulf %50, %52 : vector<8x256xf32>
    %54 = tpu.concatenate %8, %14, %20, %26, %29, %35, %41, %47, %53 in 0 : vector<8x256xf32>, vector<8x256xf32>, vector<8x256xf32>, vector<8x256xf32>, vector<8x256xf32>, vector<8x256xf32>, vector<8x256xf32>, vector<8x256xf32>, vector<8x256xf32> -> vector<72x256xf32>
    %cst = arith.constant dense<0.000000e+00> : vector<4x256xf32>
    %55 = tpu.matmul %2, %54, %cst {dimension_numbers = #tpu.dot_dimension_numbers<[1], [0], [0], [1], [0, 0, 1, 1], [], []>} : vector<4x72xf32>, vector<72x256xf32>, vector<4x256xf32> -> vector<4x256xf32>
    %c0_14 = arith.constant 0 : index
    %c0_15 = arith.constant 0 : index
    %56 = vector.load %arg4[%c0_14, %c0_15] : memref<4x1xf32, #tpu.memory_space<vmem>>, vector<4x1xf32>
    %57 = vector.broadcast %56 : vector<4x1xf32> to vector<4x256xf32>
    %58 = arith.addf %55, %57 : vector<4x256xf32>
    %cst_16 = arith.constant 0.000000e+00 : f32
    %59 = vector.broadcast %cst_16 : f32 to vector<4x256xf32>
    %60 = arith.subf %59, %58 : vector<4x256xf32>
    %61 = math.exp %60 : vector<4x256xf32>
    %cst_17 = arith.constant 1.000000e+00 : f32
    %62 = vector.broadcast %cst_17 : f32 to vector<4x256xf32>
    %63 = arith.addf %62, %61 : vector<4x256xf32>
    %cst_18 = arith.constant 1.000000e+00 : f32
    %64 = vector.broadcast %cst_18 : f32 to vector<4x256xf32>
    %65 = arith.divf %64, %63 : vector<4x256xf32>
    %66 = arith.mulf %58, %65 : vector<4x256xf32>
    %c0_19 = arith.constant 0 : index
    %c0_20 = arith.constant 0 : index
    %67 = vector.load %arg5[%c0_19, %c0_20] : memref<8x36xf32, #tpu.memory_space<vmem>>, vector<8x36xf32>
    %68 = vector.extract_strided_slice %66 {offsets = [0, 239], sizes = [4, 17], strides = [1, 1]} : vector<4x256xf32> to vector<4x17xf32>
    %69 = vector.extract_strided_slice %66 {offsets = [0, 0], sizes = [4, 239], strides = [1, 1]} : vector<4x256xf32> to vector<4x239xf32>
    %70 = tpu.concatenate %68, %69 in 1 : vector<4x17xf32>, vector<4x239xf32> -> vector<4x256xf32>
    %c0_21 = arith.constant 0 : index
    %c0_22 = arith.constant 0 : index
    %71 = vector.load %arg1[%c0_21, %c0_22] : memref<9x256xf32, #tpu.memory_space<vmem>>, vector<1x256xf32>
    %72 = vector.broadcast %71 : vector<1x256xf32> to vector<4x256xf32>
    %73 = arith.mulf %70, %72 : vector<4x256xf32>
    %74 = vector.extract_strided_slice %66 {offsets = [0, 240], sizes = [4, 16], strides = [1, 1]} : vector<4x256xf32> to vector<4x16xf32>
    %75 = vector.extract_strided_slice %66 {offsets = [0, 0], sizes = [4, 240], strides = [1, 1]} : vector<4x256xf32> to vector<4x240xf32>
    %76 = tpu.concatenate %74, %75 in 1 : vector<4x16xf32>, vector<4x240xf32> -> vector<4x256xf32>
    %c1_23 = arith.constant 1 : index
    %c0_24 = arith.constant 0 : index
    %77 = vector.load %arg1[%c1_23, %c0_24] : memref<9x256xf32, #tpu.memory_space<vmem>>, vector<1x256xf32>
    %78 = vector.broadcast %77 : vector<1x256xf32> to vector<4x256xf32>
    %79 = arith.mulf %76, %78 : vector<4x256xf32>
    %80 = vector.extract_strided_slice %66 {offsets = [0, 241], sizes = [4, 15], strides = [1, 1]} : vector<4x256xf32> to vector<4x15xf32>
    %81 = vector.extract_strided_slice %66 {offsets = [0, 0], sizes = [4, 241], strides = [1, 1]} : vector<4x256xf32> to vector<4x241xf32>
    %82 = tpu.concatenate %80, %81 in 1 : vector<4x15xf32>, vector<4x241xf32> -> vector<4x256xf32>
    %c2_25 = arith.constant 2 : index
    %c0_26 = arith.constant 0 : index
    %83 = vector.load %arg1[%c2_25, %c0_26] : memref<9x256xf32, #tpu.memory_space<vmem>>, vector<1x256xf32>
    %84 = vector.broadcast %83 : vector<1x256xf32> to vector<4x256xf32>
    %85 = arith.mulf %82, %84 : vector<4x256xf32>
    %86 = vector.extract_strided_slice %66 {offsets = [0, 255], sizes = [4, 1], strides = [1, 1]} : vector<4x256xf32> to vector<4x1xf32>
    %87 = vector.extract_strided_slice %66 {offsets = [0, 0], sizes = [4, 255], strides = [1, 1]} : vector<4x256xf32> to vector<4x255xf32>
    %88 = tpu.concatenate %86, %87 in 1 : vector<4x1xf32>, vector<4x255xf32> -> vector<4x256xf32>
    %c3_27 = arith.constant 3 : index
    %c0_28 = arith.constant 0 : index
    %89 = vector.load %arg1[%c3_27, %c0_28] : memref<9x256xf32, #tpu.memory_space<vmem>>, vector<1x256xf32>
    %90 = vector.broadcast %89 : vector<1x256xf32> to vector<4x256xf32>
    %91 = arith.mulf %88, %90 : vector<4x256xf32>
    %c4_29 = arith.constant 4 : index
    %c0_30 = arith.constant 0 : index
    %92 = vector.load %arg1[%c4_29, %c0_30] : memref<9x256xf32, #tpu.memory_space<vmem>>, vector<1x256xf32>
    %93 = vector.broadcast %92 : vector<1x256xf32> to vector<4x256xf32>
    %94 = arith.mulf %66, %93 : vector<4x256xf32>
    %95 = vector.extract_strided_slice %66 {offsets = [0, 1], sizes = [4, 255], strides = [1, 1]} : vector<4x256xf32> to vector<4x255xf32>
    %96 = vector.extract_strided_slice %66 {offsets = [0, 0], sizes = [4, 1], strides = [1, 1]} : vector<4x256xf32> to vector<4x1xf32>
    %97 = tpu.concatenate %95, %96 in 1 : vector<4x255xf32>, vector<4x1xf32> -> vector<4x256xf32>
    %c5_31 = arith.constant 5 : index
    %c0_32 = arith.constant 0 : index
    %98 = vector.load %arg1[%c5_31, %c0_32] : memref<9x256xf32, #tpu.memory_space<vmem>>, vector<1x256xf32>
    %99 = vector.broadcast %98 : vector<1x256xf32> to vector<4x256xf32>
    %100 = arith.mulf %97, %99 : vector<4x256xf32>
    %101 = vector.extract_strided_slice %66 {offsets = [0, 15], sizes = [4, 241], strides = [1, 1]} : vector<4x256xf32> to vector<4x241xf32>
    %102 = vector.extract_strided_slice %66 {offsets = [0, 0], sizes = [4, 15], strides = [1, 1]} : vector<4x256xf32> to vector<4x15xf32>
    %103 = tpu.concatenate %101, %102 in 1 : vector<4x241xf32>, vector<4x15xf32> -> vector<4x256xf32>
    %c6_33 = arith.constant 6 : index
    %c0_34 = arith.constant 0 : index
    %104 = vector.load %arg1[%c6_33, %c0_34] : memref<9x256xf32, #tpu.memory_space<vmem>>, vector<1x256xf32>
    %105 = vector.broadcast %104 : vector<1x256xf32> to vector<4x256xf32>
    %106 = arith.mulf %103, %105 : vector<4x256xf32>
    %107 = vector.extract_strided_slice %66 {offsets = [0, 16], sizes = [4, 240], strides = [1, 1]} : vector<4x256xf32> to vector<4x240xf32>
    %108 = vector.extract_strided_slice %66 {offsets = [0, 0], sizes = [4, 16], strides = [1, 1]} : vector<4x256xf32> to vector<4x16xf32>
    %109 = tpu.concatenate %107, %108 in 1 : vector<4x240xf32>, vector<4x16xf32> -> vector<4x256xf32>
    %c7_35 = arith.constant 7 : index
    %c0_36 = arith.constant 0 : index
    %110 = vector.load %arg1[%c7_35, %c0_36] : memref<9x256xf32, #tpu.memory_space<vmem>>, vector<1x256xf32>
    %111 = vector.broadcast %110 : vector<1x256xf32> to vector<4x256xf32>
    %112 = arith.mulf %109, %111 : vector<4x256xf32>
    %113 = vector.extract_strided_slice %66 {offsets = [0, 17], sizes = [4, 239], strides = [1, 1]} : vector<4x256xf32> to vector<4x239xf32>
    %114 = vector.extract_strided_slice %66 {offsets = [0, 0], sizes = [4, 17], strides = [1, 1]} : vector<4x256xf32> to vector<4x17xf32>
    %115 = tpu.concatenate %113, %114 in 1 : vector<4x239xf32>, vector<4x17xf32> -> vector<4x256xf32>
    %c8_37 = arith.constant 8 : index
    %c0_38 = arith.constant 0 : index
    %116 = vector.load %arg1[%c8_37, %c0_38] : memref<9x256xf32, #tpu.memory_space<vmem>>, vector<1x256xf32>
    %117 = vector.broadcast %116 : vector<1x256xf32> to vector<4x256xf32>
    %118 = arith.mulf %115, %117 : vector<4x256xf32>
    %119 = tpu.concatenate %73, %79, %85, %91, %94, %100, %106, %112, %118 in 0 : vector<4x256xf32>, vector<4x256xf32>, vector<4x256xf32>, vector<4x256xf32>, vector<4x256xf32>, vector<4x256xf32>, vector<4x256xf32>, vector<4x256xf32>, vector<4x256xf32> -> vector<36x256xf32>
    %cst_39 = arith.constant dense<0.000000e+00> : vector<8x256xf32>
    %120 = tpu.matmul %67, %119, %cst_39 {dimension_numbers = #tpu.dot_dimension_numbers<[1], [0], [0], [1], [0, 0, 1, 1], [], []>} : vector<8x36xf32>, vector<36x256xf32>, vector<8x256xf32> -> vector<8x256xf32>
    %c0_40 = arith.constant 0 : index
    %c0_41 = arith.constant 0 : index
    %121 = vector.load %arg6[%c0_40, %c0_41] : memref<8x1xf32, #tpu.memory_space<vmem>>, vector<8x1xf32>
    %122 = vector.broadcast %121 : vector<8x1xf32> to vector<8x256xf32>
    %123 = arith.addf %120, %122 : vector<8x256xf32>
    %cst_42 = arith.constant 0.000000e+00 : f32
    %124 = vector.broadcast %cst_42 : f32 to vector<8x256xf32>
    %125 = arith.subf %124, %123 : vector<8x256xf32>
    %126 = math.exp %125 : vector<8x256xf32>
    %cst_43 = arith.constant 1.000000e+00 : f32
    %127 = vector.broadcast %cst_43 : f32 to vector<8x256xf32>
    %128 = arith.addf %127, %126 : vector<8x256xf32>
    %cst_44 = arith.constant 1.000000e+00 : f32
    %129 = vector.broadcast %cst_44 : f32 to vector<8x256xf32>
    %130 = arith.divf %129, %128 : vector<8x256xf32>
    %131 = arith.mulf %123, %130 : vector<8x256xf32>
    %132 = arith.addf %131, %1 : vector<8x256xf32>
    %c0_45 = arith.constant 0 : index
    %c0_46 = arith.constant 0 : index
    %c0_47 = arith.constant 0 : index
    %133 = vector.load %arg7[%c0_45, %c0_46, %c0_47] : memref<1x8x256xf32, #tpu.memory_space<vmem>>, vector<1x8x256xf32>
    %134 = vector.shape_cast %133 : vector<1x8x256xf32> to vector<8x256xf32>
    %135 = vector.shape_cast %132 : vector<8x256xf32> to vector<1x8x256xf32>
    tpu.vector_store %arg7[%c0_45, %c0_46, %c0_47], %135 {strides = array<i32>} : memref<1x8x256xf32, #tpu.memory_space<vmem>>, vector<1x8x256xf32>,
    return
  }
  func.func @transform_0(%arg0: i32) -> (i32, i32) {
    %c0_i32 = arith.constant 0 : i32
    %c0_i32_0 = arith.constant 0 : i32
    %c0_i32_1 = arith.constant 0 : i32
    return %c0_i32, %c0_i32_0 : i32, i32
  }
  func.func @transform_1(%arg0: i32) -> (i32, i32, i32) {
    %c0_i32 = arith.constant 0 : i32
    %c0_i32_0 = arith.constant 0 : i32
    %c0_i32_1 = arith.constant 0 : i32
    return %arg0, %c0_i32, %c0_i32_0 : i32, i32, i32
  }
  func.func @transform_2(%arg0: i32) -> (i32, i32) {
    %c0_i32 = arith.constant 0 : i32
    %c0_i32_0 = arith.constant 0 : i32
    %c0_i32_1 = arith.constant 0 : i32
    return %c0_i32, %c0_i32_0 : i32, i32
  }
  func.func @transform_3(%arg0: i32) -> (i32, i32) {
    %c0_i32 = arith.constant 0 : i32
    %c0_i32_0 = arith.constant 0 : i32
    %c0_i32_1 = arith.constant 0 : i32
    return %c0_i32, %c0_i32_0 : i32, i32
  }
  func.func @transform_4(%arg0: i32) -> (i32, i32) {
    %c0_i32 = arith.constant 0 : i32
    %c0_i32_0 = arith.constant 0 : i32
    %c0_i32_1 = arith.constant 0 : i32
    return %c0_i32, %c0_i32_0 : i32, i32
  }
  func.func @transform_5(%arg0: i32) -> (i32, i32) {
    %c0_i32 = arith.constant 0 : i32
    %c0_i32_0 = arith.constant 0 : i32
    %c0_i32_1 = arith.constant 0 : i32
    return %c0_i32, %c0_i32_0 : i32, i32
  }
  func.func @transform_6(%arg0: i32) -> (i32, i32, i32) {
    %c0_i32 = arith.constant 0 : i32
    %c0_i32_0 = arith.constant 0 : i32
    %c0_i32_1 = arith.constant 0 : i32
    return %arg0, %c0_i32, %c0_i32_0 : i32, i32, i32
  }
}

</mosaic_0001>

<bundles_post_ra>
// kernel: bottleneck_forward_pallas.1
= control target key start
LH: loop header
LB: loop body
LE: loop exit
PB: predicated region body
PF: predicated region fallthrough
CT: control target
= control target key end

     0   :  { %s989_s21 = smov 0   ;;  %s1266_s0 = inlined_call_operand.vmem [shape: f32[9,256], index: 0, kind: input, shape index: {}]   ;;  %s1267_s1 = inlined_call_operand.vmem [shape: f32[2,8,256], index: 1, kind: input, shape index: {}]   ;;  %s1268_s2 = inlined_call_operand.vmem [shape: f32[4,72], index: 2, kind: input, shape index: {}]   ;;  %s1269_s3 = inlined_call_operand.vmem [shape: f32[4,1], index: 3, kind: input, shape index: {}]   ;;  %s1270_s4 = inlined_call_operand.vmem [shape: f32[8,36], index: 4, kind: input, shape index: {}]   ;;  %s1271_s5 = inlined_call_operand.vmem [shape: f32[8,1], index: 5, kind: input, shape index: {}]   ;;  %s1272_s6 = inlined_call_operand.vmem [shape: f32[2,8,256], index: 6, kind: output, shape index: {}]  }
   0x1 LB: > { %s852_s22 = sadd.s32 4294967295, %s942_s21   ;;  %p856_p0 = scmp.ge.s32.totalorder %s942_s21, 1  ;;  %s942_s21 = sphi %s989_s21, %s16_s21  }
   0x2   : > { %p212_p1 = scmp.lt.s32.totalorder %s942_s21, 3 }
   0x4   : > { %p213_p2 = pnand %p856_p0, %p212_p1 }
   0x5   : > { %p242_p3 = scmp.lt.s32.totalorder (!%p213_p2), %s852_s22, 1  ;;  %s944_s27 = smov (!%p213_p2), 16   ;;  %v950_v2 = vmov (!%p213_p2), 0.0   ;;  %v951_v3 = vmov (!%p213_p2), 0   ;;  %v471_v4 = vld [vmem:[%s1269_s3] sm:$0xf] (!%p213_p2)  ;;  %v269_v5 = vlaneseq (!%p213_p2) }
   0x6   : > { %216 = sbr.rel (%p213_p2) target bundleno = 814 (0x32e), region = 44  ;;  %s945_s28 = smov (!%p213_p2), 17   ;;  %545 = vmatprep.mubr.f32.mxu0 (!%p213_p2), %v950_v2  ;;  %772 = vmatprep.mubr.f32.mxu1 (!%p213_p2), %v950_v2  ;;  %v861_v9 = vld [vmem:[%s1266_s0 + $0x1] ss:$8 sm:$0x3] (!%p213_p2)  ;;  %vm286_vm0 = vcmask (!%p213_p2), 130048  }
   0x7   : > { %s946_s29 = smov (!%p213_p2), 15   ;;  %s947_s30 = smov (!%p213_p2), 1   ;;  %919 = vset.pattern.permute.xlu0 (!%p213_p2), %v951_v3  ;;  %v270_v6 = vshrl.u32 (!%p213_p2), %v269_v5, 7  ;;  %v267_v10 = vld [vmem:[%s1266_s0] ss:$8 sm:$0x3] (!%p213_p2) }
   0x8   : > { %s948_s7 = smov (!%p213_p2), 127   ;;  %s949_s8 = smov (!%p213_p2), 113   ;;  %vm262_vm1 = vcmask (!%p213_p2), 138240   ;;  %v862_v27 = vld [vmem:[%s1266_s0 + $0x2] ss:$8 sm:$0x3] (!%p213_p2) }
   0x9   : > { %s952_s9 = smov (!%p213_p2), 112   ;;  %s953_s10 = smov (!%p213_p2), 111   ;;  %v1044_v7 = vsub.s32 (!%p213_p2), 0, %v270_v6  ;;  %v1046_v8 = vsub.s32 (!%p213_p2), 1, %v270_v6  ;;  %vm311_vm2 = vcmask (!%p213_p2), 121856   ;;  %vm336_vm3 = vcmask (!%p213_p2), 7168  }
   0xa   : > { %v863_v28 = vld [vmem:[%s1266_s0 + $0x3] ss:$8 sm:$0x3] (!%p213_p2)  ;;  %v864_v33 = vld [vmem:[%s1266_s0 + $0x4] ss:$8 sm:$0x3] (!%p213_p2) }
   0xb   : > { %v1055_v13 = vrot.slane (!%p213_p2), %v861_v9, %v1044_v7  ;;  %v1058_v14 = vrot.slane (!%p213_p2), %v267_v10, %v1044_v7  ;;  %v1061_v15 = vrot.slane (!%p213_p2), %v267_v10, %v1046_v8  ;;  %v1064_v16 = vrot.slane (!%p213_p2), %v861_v9, %v1046_v8  ;;  %v865_v38 = vld [vmem:[%s1266_s0 + $0x5] ss:$8 sm:$0x3] (!%p213_p2)  ;;  %v866_v63 = vld [vmem:[%s1266_s0 + $0x6] ss:$8 sm:$0x3] (!%p213_p2) }
   0xc   : > { %v1084_v34 = vrot.slane (!%p213_p2), %v862_v27, %v1044_v7  ;;  %v1087_v35 = vrot.slane (!%p213_p2), %v862_v27, %v1046_v8  ;;  %v1090_v36 = vrot.slane (!%p213_p2), %v863_v28, %v1044_v7  ;;  %v1093_v37 = vrot.slane (!%p213_p2), %v863_v28, %v1046_v8  ;;  %v867_v2 = vld [vmem:[%s1266_s0 + $0x7] ss:$8 sm:$0x3] (!%p213_p2) }
   0xd   : > { %s1274_s22 = smov (!%p242_p3, %s852_s22), 1  ;;  %vm375_vm4 = vcmask 1039360   ;;  %v1101_v43 = vrot.slane %v864_v33, %v1046_v8  ;;  %v1104_v44 = vrot.slane %v864_v33, %v1044_v7  ;;  %v1109_v47 = vrot.slane %v865_v38, %v1044_v7 }
   0xe   : > { %s875_s23 = sshll.u32 %s1274_s22, 4  ;;  %v1112_v48 = vrot.slane %v865_v38, %v1046_v8  ;;  %vm400_vm5 = vcmask 924672   ;;  %v1133_v9 = vrot.slane %v866_v63, %v1044_v7  ;;  %v1136_v10 = vrot.slane %v866_v63, %v1046_v8 }
   0xf   : > { %s246_s26 = scalar_lea.vmem %s1267_s1, %s875_s23  ;;  %vm425_vm6 = vcmask 916480   ;;  %vm450_vm7 = vcmask 908288   ;;  %vm477_vm8 = vcmask 588800   ;;  %vm683_vm9 = vcmask 1043456  }
  0x10   : > { %v1005_v0 = vld [vmem:[%s246_s26 + $0x8] sm:$0xff]  ;;  %v1011_v1 = vld [vmem:[%s246_s26] sm:$0xff]  ;;  %vm698_vm10 = vcmask 293888  }
  0x11   : > { %281 = vrot.lane.b32.xlu1 %v1005_v0, %s944_s27  ;;  %256 = vrot.lane.b32.xlu0 %v1005_v0, %s945_s28  ;;  %v370_v57 = vmul.f32 %v1101_v43, %v1005_v0  ;;  %v369_v58 = vmul.f32 %v1104_v44, %v1011_v1 }
  0x15   : > { %284 = vrot.lane.b32.xlu1 %v1011_v1, %s944_s27  ;;  %260 = vrot.lane.b32.xlu0 %v1011_v1, %s945_s28 }
  0x19   : > { %309 = vrot.lane.b32.xlu1 %v1011_v1, %s946_s29  ;;  %306 = vrot.lane.b32.xlu0 %v1005_v0, %s946_s29 }
  0x1d   : > { %334 = vrot.lane.b32.xlu1 %v1011_v1, %s947_s30  ;;  %331 = vrot.lane.b32.xlu0 %v1005_v0, %s947_s30 }
  0x21   : > { %373 = vrot.lane.b32.xlu1 %v1005_v0, %s948_s7  ;;  %371 = vrot.lane.b32.xlu0 %v1011_v1, %s948_s7 }
  0x25   : > { %398 = vrot.lane.b32.xlu1 %v1005_v0, %s949_s8  ;;  %396 = vrot.lane.b32.xlu0 %v1011_v1, %s949_s8 }
  0x29   : > { %423 = vrot.lane.b32.xlu1 %v1005_v0, %s952_s9  ;;  %421 = vrot.lane.b32.xlu0 %v1011_v1, %s952_s9 }
  0x2d   : > { %448 = vrot.lane.b32.xlu1 %v1005_v0, %s953_s10  ;;  %446 = vrot.lane.b32.xlu0 %v1011_v1, %s953_s10 }
  0x31   : > { %474 = vperm.xlu0 %919, %v471_v4  }
  0x83   : > { %v282_v11 = vpop.permute.xlu1 %281  ;;  %v257_v12 = vpop.permute.xlu0 %256 }
  0x87   : > { %v285_v17 = vpop.permute.xlu1 %284  ;;  %v261_v18 = vpop.permute.xlu0 %260 }
  0x88   : > { %v287_v19 = vsel %vm286_vm0, %v285_v17, %v282_v11  ;;  %v290_v20 = vsel %vm286_vm0, %v282_v11, %v285_v17  ;;  %v263_v21 = vsel %vm262_vm1, %v261_v18, %v257_v12  ;;  %v266_v22 = vsel %vm262_vm1, %v257_v12, %v261_v18  ;;  %v868_v17 = vld [vmem:[%s1266_s0 + $0x10] ss:$8 sm:$0x3] }
  0x89   : > { %v304_v23 = vmul.f32 %v1055_v13, %v290_v20  ;;  %v279_v24 = vmul.f32 %v1058_v14, %v266_v22  ;;  %v280_v25 = vmul.f32 %v1061_v15, %v263_v21  ;;  %v305_v26 = vmul.f32 %v1064_v16, %v287_v19 }
  0x8a   : > { %v1139_v11 = vrot.slane %v867_v2, %v1044_v7  ;;  %v1142_v12 = vrot.slane %v867_v2, %v1046_v8 }
  0x8b   : > { %v310_v29 = vpop.permute.xlu1 %309  ;;  %v307_v30 = vpop.permute.xlu0 %306  ;;  %v877_v31 = vpack.c.bf16 %v305_v26, %v280_v25  ;;  %v879_v32 = vpack.c.bf16 %v304_v23, %v279_v24  ;;  %v1152_v24 = vrot.slane %v868_v17, %v1046_v8 }
  0x8c   : > { %v312_v39 = vsel %vm311_vm2, %v310_v29, %v307_v30  ;;  %v315_v40 = vsel %vm311_vm2, %v307_v30, %v310_v29  ;;  %v1159_v29 = vrot.slane %v868_v17, %v1044_v7  ;;  %v254_v7 = vld [vmem:[%s1268_s2] sm:$0xf] }
  0x8d   : > { %878 = vmatprep.subr.bf16.mxu0 %v877_v31  ;;  %v329_v49 = vmul.f32 %v1084_v34, %v315_v40  ;;  %v330_v50 = vmul.f32 %v1087_v35, %v312_v39 }
  0x8e   : > { %880 = vmatpush1.bf16.msra.mxu0 %v879_v32 }
  0x8f   : > { %v335_v41 = vpop.permute.xlu1 %334  ;;  %v332_v42 = vpop.permute.xlu0 %331 }
  0x90   : > { %v337_v45 = vsel %vm336_vm3, %v335_v41, %v332_v42  ;;  %v340_v46 = vsel %vm336_vm3, %v332_v42, %v335_v41 }
  0x91   : > { %v354_v51 = vmul.f32 %v1090_v36, %v340_v46  ;;  %v355_v52 = vmul.f32 %v1093_v37, %v337_v45 }
  0x93   : > { %v374_v53 = vpop.permute.xlu1 %373  ;;  %v372_v54 = vpop.permute.xlu0 %371  ;;  %v881_v55 = vpack.c.bf16 %v355_v52, %v330_v50  ;;  %v883_v56 = vpack.c.bf16 %v354_v51, %v329_v49 }
  0x94   : > { %v376_v59 = vsel %vm375_vm4, %v372_v54, %v374_v53  ;;  %v380_v60 = vsel %vm375_vm4, %v374_v53, %v372_v54 }
  0x95   : > { %v394_v61 = vmul.f32 %v1109_v47, %v376_v59  ;;  %v395_v62 = vmul.f32 %v1112_v48, %v380_v60  ;;  %882 = vmatprep.subr.bf16.mxu0 %v881_v55 }
  0x96   : > { %884 = vmatpush1.bf16.msra.mxu0 %v883_v56 }
  0x97   : > { %v399_v3 = vpop.permute.xlu1 %398  ;;  %v397_v4 = vpop.permute.xlu0 %396  ;;  %v885_v5 = vpack.c.bf16 %v395_v62, %v370_v57  ;;  %v887_v6 = vpack.c.bf16 %v394_v61, %v369_v58  ;;  %v692_v62 = vld [vmem:[%s1271_s5] sm:$0xff] }
  0x98   : > { %v401_v18 = vsel %vm400_vm5, %v397_v4, %v399_v3  ;;  %v405_v19 = vsel %vm400_vm5, %v399_v3, %v397_v4 }
  0x99   : > { %886 = vmatprep.subr.bf16.mxu0 %v885_v5  ;;  %v419_v25 = vmul.f32 %v1133_v9, %v401_v18  ;;  %v420_v26 = vmul.f32 %v1136_v10, %v405_v19 }
  0x9a   : > { %888 = vmatpush1.bf16.msra.mxu0 %v887_v6 }
  0x9b   : > { %v424_v20 = vpop.permute.xlu1 %423  ;;  %v422_v21 = vpop.permute.xlu0 %421 }
  0x9c   : > { %v426_v22 = vsel %vm425_vm6, %v422_v21, %v424_v20  ;;  %v430_v23 = vsel %vm425_vm6, %v424_v20, %v422_v21 }
  0x9d   : > { %v444_v27 = vmul.f32 %v1139_v11, %v426_v22  ;;  %v445_v28 = vmul.f32 %v1142_v12, %v430_v23 }
  0x9f   : > { %v449_v30 = vpop.permute.xlu1 %448  ;;  %v447_v31 = vpop.permute.xlu0 %446  ;;  %v889_v32 = vpack.c.bf16 %v445_v28, %v420_v26  ;;  %v891_v33 = vpack.c.bf16 %v444_v27, %v419_v25 }
  0xa0   : > { %v451_v38 = vsel %vm450_vm7, %v447_v31, %v449_v30  ;;  %v455_v8 = vsel %vm450_vm7, %v449_v30, %v447_v31 }
  0xa1   : > { %v470_v39 = vmul.f32 %v1152_v24, %v455_v8  ;;  %890 = vmatprep.subr.bf16.mxu0 %v889_v32  ;;  %v469_v40 = vmul.f32 %v1159_v29, %v451_v38 }
  0xa2   : > { %892 = vmatpush1.bf16.msra.mxu0 %v891_v33 }
  0xa3   : > { %497 = vmatprep.subr.mxu0 %v470_v39 }
  0xa6   : > { %498 = vmatpush1.msra.mxu0 %v469_v40 }
  0xa7   : > { %869 = vmatmul.mubr.msk.f32.vlgmr.msra.gmra.mrb[0].mxu0 %vm477_vm8, %v254_v7 }
  0xb0   : > { %v475_v41 = vpop.permute.xlu0 %474 }
 0x17a   : > { %v547_v42 = vpop.f32.mrb[0].mxu0 }
 0x17b   : > { %v548_v45 = vadd.f32 %v547_v42, %v475_v41  ;;  %v549_v46 = vpop.f32.mrb[1].mxu0 }
 0x17c   : > { %v550_v49 = vadd.f32 %v549_v46, %v475_v41 }
 0x17d   : > { %v552_v50 = vsub.f32 0.0, %v548_v45 }
 0x17e   : > { %v553_v51 = vsub.f32 0.0, %v550_v49 }
 0x17f   : > { %v554_v52 = vmul.f32 1.442695, %v552_v50 }
 0x180   : > { %v556_v53 = vmul.f32 1.442695, %v553_v51 }
 0x181   : > { %920 = vpow2.f32 %v554_v52 }
 0x182   : > { %922 = vpow2.f32 %v556_v53 }
 0x18b   : > { %v921_v54 = vpop.eup %920 }
 0x18c   : > { %v558_v55 = vadd.f32 1.0, %v921_v54  ;;  %v923_v56 = vpop.eup %922 }
 0x18d   : > { %v559_v57 = vadd.f32 1.0, %v923_v56 }
 0x18e   : > { %924 = vrcp.f32 %v558_v55 }
 0x18f   : > { %926 = vrcp.f32 %v559_v57 }
 0x198   : > { %v925_v58 = vpop.eup %924 }
 0x199   : > { %v1168_v59 = vmul.f32 %v925_v58, %v548_v45  ;;  %v927_v60 = vpop.eup %926 }
 0x19a   : > { %v1178_v61 = vmul.f32 %v927_v60, %v550_v49 }
 0x19b   : > { %615 = vrot.lane.b32.xlu0 %v1168_v59, %s948_s7  ;;  %583 = vrot.lane.b32.xlu1 %v1168_v59, %s944_s27 }
 0x19f   : > { %637 = vrot.lane.b32.xlu0 %v1168_v59, %s952_s9  ;;  %605 = vrot.lane.b32.xlu1 %v1168_v59, %s947_s30 }
 0x1a3   : > { %602 = vrot.lane.b32.xlu0 %v1178_v61, %s947_s30  ;;  %572 = vrot.lane.b32.xlu1 %v1168_v59, %s945_s28 }
 0x1a7   : > { %568 = vrot.lane.b32.xlu0 %v1178_v61, %s945_s28  ;;  %594 = vrot.lane.b32.xlu1 %v1168_v59, %s946_s29 }
 0x1ab   : > { %591 = vrot.lane.b32.xlu0 %v1178_v61, %s946_s29  ;;  %580 = vrot.lane.b32.xlu1 %v1178_v61, %s944_s27 }
 0x1af   : > { %626 = vrot.lane.b32.xlu0 %v1168_v59, %s949_s8  ;;  %617 = vrot.lane.b32.xlu1 %v1178_v61, %s948_s7 }
 0x1b3   : > { %648 = vrot.lane.b32.xlu0 %v1168_v59, %s953_s10  ;;  %639 = vrot.lane.b32.xlu1 %v1178_v61, %s952_s9  ;;  %s251_s9 = scalar_lea.vmem %s1272_s6, %s875_s23 }
 0x1b7   : > { %695 = vperm.xlu0 %919, %v692_v62   ;;  %628 = vrot.lane.b32.xlu1 %v1178_v61, %s949_s8 }
 0x1bb   : > { %650 = vrot.lane.b32.xlu1 %v1178_v61, %s953_s10 }
 0x20d   : > { %v616_v63 = vpop.permute.xlu0 %615  ;;  %v584_v2 = vpop.permute.xlu1 %583 }
 0x211   : > { %v638_v3 = vpop.permute.xlu0 %637  ;;  %v606_v4 = vpop.permute.xlu1 %605 }
 0x215   : > { %v603_v5 = vpop.permute.xlu0 %602  ;;  %v573_v6 = vpop.permute.xlu1 %572 }
 0x216   : > { %v607_v17 = vsel %vm336_vm3, %v606_v4, %v603_v5  ;;  %v610_v18 = vsel %vm336_vm3, %v603_v5, %v606_v4 }
 0x217   : > { %v611_v21 = vmul.f32 %v610_v18, %v1090_v36  ;;  %v612_v22 = vmul.f32 %v607_v17, %v1093_v37 }
 0x219   : > { %v569_v19 = vpop.permute.xlu0 %568  ;;  %v595_v20 = vpop.permute.xlu1 %594  ;;  %v667_v8 = vrot.slane %v611_v21, 4  ;;  %v668_v39 = vrot.slane %v612_v22, 4  ;;  %v566_v21 = vld [vmem:[%s1270_s4] sm:$0xff] }
 0x21a   : > { %v574_v23 = vsel %vm262_vm1, %v573_v6, %v569_v19  ;;  %v577_v25 = vsel %vm262_vm1, %v569_v19, %v573_v6 }
 0x21b   : > { %v578_v40 = vmul.f32 %v577_v25, %v1058_v14  ;;  %v579_v7 = vmul.f32 %v574_v23, %v1061_v15 }
 0x21d   : > { %v592_v26 = vpop.permute.xlu0 %591  ;;  %v581_v27 = vpop.permute.xlu1 %580 }
 0x21e   : > { %v596_v28 = vsel %vm311_vm2, %v595_v20, %v592_v26  ;;  %v599_v30 = vsel %vm311_vm2, %v592_v26, %v595_v20  ;;  %v585_v31 = vsel %vm286_vm0, %v584_v2, %v581_v27  ;;  %v588_v32 = vsel %vm286_vm0, %v581_v27, %v584_v2 }
 0x21f   : > { %v600_v33 = vmul.f32 %v599_v30, %v1084_v34  ;;  %v601_v36 = vmul.f32 %v596_v28, %v1087_v35  ;;  %v589_v37 = vmul.f32 %v588_v32, %v1055_v13  ;;  %v590_v38 = vmul.f32 %v585_v31, %v1064_v16 }
 0x220   : > { %v613_v2 = vmul.f32 %v1168_v59, %v1104_v44 }
 0x221   : > { %v661_v41 = vrot.slane %v589_v37, 4  ;;  %v662_v42 = vrot.slane %v590_v38, 4  ;;  %v618_v45 = vpop.permute.xlu1 %617  ;;  %v687_v13 = vsel %vm683_vm9, %v601_v36, %v668_v39  ;;  %v686_v49 = vsel %vm683_vm9, %v600_v33, %v667_v8  ;;  %v627_v55 = vpop.permute.xlu0 %626 }
 0x222   : > { %v619_v46 = vsel %vm375_vm4, %v616_v63, %v618_v45  ;;  %v623_v34 = vsel %vm375_vm4, %v618_v45, %v616_v63 }
 0x223   : > { %v685_v35 = vsel %vm683_vm9, %v579_v7, %v662_v42  ;;  %v684_v16 = vsel %vm683_vm9, %v578_v40, %v661_v41  ;;  %v624_v14 = vmul.f32 %v619_v46, %v1109_v47  ;;  %v625_v15 = vmul.f32 %v623_v34, %v1112_v48 }
 0x224   : > { %v893_v50 = vpack.c.bf16 %v687_v13, %v685_v35  ;;  %v895_v51 = vpack.c.bf16 %v686_v49, %v684_v16  ;;  %v614_v48 = vmul.f32 %v1178_v61, %v1101_v43 }
 0x225   : > { %v640_v52 = vpop.permute.xlu1 %639  ;;  %v673_v58 = vrot.slane %v624_v14, 4  ;;  %v674_v60 = vrot.slane %v625_v15, 4  ;;  %v649_v5 = vpop.permute.xlu0 %648 }
 0x226   : > { %v641_v53 = vsel %vm425_vm6, %v638_v3, %v640_v52  ;;  %v645_v54 = vsel %vm425_vm6, %v640_v52, %v638_v3  ;;  %894 = vmatprep.subr.bf16.mxu1 %v893_v50 }
 0x227   : > { %v646_v56 = vmul.f32 %v641_v53, %v1139_v11  ;;  %v647_v57 = vmul.f32 %v645_v54, %v1142_v12  ;;  %896 = vmatpush1.bf16.msra.mxu1 %v895_v51  ;;  %v689_v17 = vsel %vm683_vm9, %v614_v48, %v674_v60  ;;  %v688_v19 = vsel %vm683_vm9, %v613_v2, %v673_v58 }
 0x229   : > { %v629_v62 = vpop.permute.xlu1 %628  ;;  %v679_v3 = vrot.slane %v646_v56, 4  ;;  %v680_v4 = vrot.slane %v647_v57, 4 }
 0x22a   : > { %v630_v63 = vsel %vm400_vm5, %v627_v55, %v629_v62  ;;  %v634_v47 = vsel %vm400_vm5, %v629_v62, %v627_v55 }
 0x22b   : > { %v635_v11 = vmul.f32 %v630_v63, %v1133_v9  ;;  %v636_v12 = vmul.f32 %v634_v47, %v1136_v10 }
 0x22d   : > { %v651_v6 = vpop.permute.xlu1 %650  ;;  %v691_v18 = vsel %vm683_vm9, %v636_v12, %v680_v4  ;;  %v690_v20 = vsel %vm683_vm9, %v635_v11, %v679_v3 }
 0x22e   : > { %v656_v43 = vsel %vm450_vm7, %v651_v6, %v649_v5  ;;  %v897_v61 = vpack.c.bf16 %v691_v18, %v689_v17  ;;  %v899_v44 = vpack.c.bf16 %v690_v20, %v688_v19  ;;  %v652_v9 = vsel %vm450_vm7, %v649_v5, %v651_v6 }
 0x22f   : > { %v658_v59 = vmul.f32 %v656_v43, %v1152_v24  ;;  %v657_v10 = vmul.f32 %v652_v9, %v1159_v29 }
 0x230   : > { %898 = vmatprep.subr.bf16.mxu1 %v897_v61 }
 0x231   : > { %900 = vmatpush1.bf16.msra.mxu1 %v899_v44 }
 0x232   : > { %870 = vmatprep.subr.msk.mxu1 %vm683_vm9, %v658_v59 }
 0x235   : > { %871 = vmatpush1.msk.msra.mxu1 %vm683_vm9, %v657_v10 }
 0x236   : > { %872 = vmatmul.mubr.msk.f32.vlgmr.msra.gmra.mrb[0].mxu1 %vm698_vm10, %v566_v21  ;;  %v696_v22 = vpop.permute.xlu0 %695 }
 0x309   : > { %v774_v23 = vpop.f32.mrb[0].mxu1 }
 0x30a   : > { %v775_v25 = vadd.f32 %v774_v23, %v696_v22  ;;  %v776_v24 = vpop.f32.mrb[1].mxu1 }
 0x30b   : > { %v777_v26 = vadd.f32 %v776_v24, %v696_v22 }
 0x30c   : > { %v779_v27 = vsub.f32 0.0, %v775_v25 }
 0x30d   : > { %v780_v28 = vsub.f32 0.0, %v777_v26 }
 0x30e   : > { %v781_v30 = vmul.f32 1.442695, %v779_v27 }
 0x30f   : > { %v783_v31 = vmul.f32 1.442695, %v780_v28 }
 0x310   : > { %928 = vpow2.f32 %v781_v30 }
 0x311   : > { %930 = vpow2.f32 %v783_v31 }
 0x31a   : > { %v929_v29 = vpop.eup %928 }
 0x31b   : > { %v931_v32 = vpop.eup %930  ;;  %v785_v33 = vadd.f32 1.0, %v929_v29 }
 0x31c   : > { %v786_v36 = vadd.f32 1.0, %v931_v32 }
 0x31d   : > { %932 = vrcp.f32 %v785_v33 }
 0x31e   : > { %934 = vrcp.f32 %v786_v36 }
 0x327   : > { %v933_v37 = vpop.eup %932 }
 0x328   : > { %v935_v38 = vpop.eup %934  ;;  %v791_v8 = vmul.f32 %v933_v37, %v775_v25 }
 0x329   : > { %v792_v39 = vmul.f32 %v935_v38, %v777_v26 }
 0x32a   : > { %v793_v40 = vadd.f32 %v791_v8, %v1011_v1 }
 0x32b   : > { %v794_v7 = vadd.f32 %v792_v39, %v1005_v0 }
 0x32c   : > { %795 = vst [vmem:[%s251_s9] sm:$0xff] %v793_v40 }
 0x32d   : > { %796 = vst [vmem:[%s251_s9 + $0x8] sm:$0xff] %v794_v7 }
 0x32e PF: > { %s16_s21 = sadd.s32 1, %s942_s21  }
 0x32f   : > { %p13_p4 = scmp.ge.s32.totalorder %s16_s21, 4  }
 0x331   :  { %15 = sbr.rel (!%p13_p4) target bundleno = 1 (0x1), region = 82 }

</bundles_post_ra>
